<compile_context>
chip_gen: v7x
topology: tpu7x:2x2x1
jax: 0.10.0
libtpu: 0.0.40
codegen_flags: <defaults>
</compile_context>

<pallas_src>
import functools

import jax
import jax.numpy as jnp
from jax.experimental import pallas as pl
from jax.experimental.pallas import tpu as pltpu


def resblock_kernel(x_ref, w1_ref, b1_ref, w2_ref, b2_ref, o_ref, *, height, ksize):
    # x_ref / o_ref : (M, WC)  with M = NB*H rows (NB images stacked), WC = W*C
    # w*_ref        : (K*WC, WC) bf16 stacked banded conv weights
    # b*_ref        : (1, WC)  f32 bias rows (res_scale already folded into w2/b2)
    M, WC = x_ref.shape
    p = ksize // 2

    x_f32 = x_ref[...].astype(jnp.float32)        # residual path stays exact f32

    # Row index within its image; hoisted once, reused by both convs / all taps.
    row = jax.lax.broadcasted_iota(jnp.int32, (M, 1), 0) % height

    def shifted_taps(x):
        """Concat the K vertically shifted copies of x along lanes -> (M, K*WC).

        Shift = sublane roll on the flattened row axis; rows whose source lies
        outside the current image (top/bottom 'same' padding, or a neighbouring
        image after the roll) are zeroed by the mask."""
        taps = []
        for k in range(ksize):
            s = p - k                              # xs[h] = x[h - s] = x[h + k - p]
            if s == 0:
                xs = x
            else:
                xs = pltpu.roll(x, shift=s % M, axis=0)
                valid = (row >= s) & (row < height + s)
                xs = jnp.where(valid, xs, 0.0)
            taps.append(xs)
        return jnp.concatenate(taps, axis=-1)

    def conv(xf, w_ref, b_ref):
        lhs = shifted_taps(xf).astype(jnp.bfloat16)          # single bf16 cast (MXU operand)
        return jnp.dot(lhs, w_ref[...],
                       preferred_element_type=jnp.float32) + b_ref[...]

    h1 = jnp.maximum(conv(x_f32, w1_ref, b1_ref), 0.0)       # conv1 + ReLU (f32 VPU)
    h2 = conv(h1, w2_ref, b2_ref)                            # conv2 (res_scale pre-folded)
    o_ref[...] = (x_f32 + h2).astype(o_ref.dtype)


def _build_stacked_weights(w, width):
    """Fold the kw taps + 'same' zero padding along W into banded matrices and
    stack the K vertical taps along rows.

    w: (K, K, Cin, Cout) HWIO conv weights
    returns: (K*width*Cin, width*Cout) with rows [k*WC:(k+1)*WC] =
      Wb[k, wi*Cin+ci, wo*Cout+co] = w[k, wi-wo+p, ci, co] if |wi-wo| <= p else 0
    """
    K = w.shape[0]
    cin, cout = w.shape[2], w.shape[3]
    p = K // 2
    wi = jnp.arange(width)[:, None]               # (W, 1)
    wo = jnp.arange(width)[None, :]               # (1, W)
    kw = wi - wo + p                              # (W, W)
    valid = (kw >= 0) & (kw < K)
    kw_c = jnp.clip(kw, 0, K - 1)
    wb = w[:, kw_c]                               # (K, W, W, Cin, Cout)
    wb = jnp.where(valid[None, :, :, None, None], wb, 0.0)
    wb = jnp.transpose(wb, (0, 1, 3, 2, 4)).reshape(K, width * cin, width * cout)
    return wb.reshape(K * width * cin, width * cout)


def resblock_pallas(x_nhwc, w1, b1, w2, b2, res_scale=1.0):
    """x_nhwc: (N, H, W, C); w*: (K, K, C_in, C_out) HWIO; b*: (1, C)."""
    N, H, W, C = x_nhwc.shape
    K = w1.shape[0]
    WC = W * C

    # Rows-per-grid-step: target >=256 MXU rows, but keep >=2 parallel grid
    # steps so both v7x TensorCores get work; also require NB | N.
    target_rows = 256
    nb = min(N, max(1, -(-target_rows // H)))
    while nb > 1 and (N // nb) < 2:
        nb -= 1
    while N % nb != 0:
        nb -= 1
    M = nb * H

    # Lane-dense presentation: (N*H, W*C); contiguous -> free reshape.
    x2d = x_nhwc.reshape(N * H, WC)

    # Stacked banded weights (bf16 for the MXU); res_scale folded into conv2.
    rs = jnp.asarray(res_scale, jnp.float32)
    w1s = _build_stacked_weights(w1, W).astype(jnp.bfloat16)            # (K*WC, WC)
    w2s = _build_stacked_weights(w2 * rs, W).astype(jnp.bfloat16)       # (K*WC, WC)
    b1r = jnp.tile(b1.reshape(1, C).astype(jnp.float32), (1, W))        # (1, WC)
    b2r = jnp.tile((b2 * rs).reshape(1, C).astype(jnp.float32), (1, W)) # (1, WC)

    kern = functools.partial(resblock_kernel, height=H, ksize=K)
    out2d = pl.pallas_call(
        kern,
        out_shape=jax.ShapeDtypeStruct((N * H, WC), x_nhwc.dtype),
        grid=(N // nb,),
        in_specs=[
            pl.BlockSpec((M, WC), lambda b: (b, 0)),
            pl.BlockSpec((K * WC, WC), lambda b: (0, 0)),
            pl.BlockSpec((1, WC), lambda b: (0, 0)),
            pl.BlockSpec((K * WC, WC), lambda b: (0, 0)),
            pl.BlockSpec((1, WC), lambda b: (0, 0)),
        ],
        out_specs=pl.BlockSpec((M, WC), lambda b: (b, 0)),
        compiler_params=pltpu.CompilerParams(
            dimension_semantics=("parallel",),
            vmem_limit_bytes=32 * 1024 * 1024),
    )(x2d, w1s, b1r, w2s, b2r)
    return out2d.reshape(N, H, W, C)


def resblock_reference(x_nhwc, w1, b1, w2, b2, res_scale=1.0):
    dn = ('NHWC', 'HWIO', 'NHWC')
    h = jax.lax.conv_general_dilated(x_nhwc, w1, (1, 1), 'SAME',
                                     dimension_numbers=dn) + b1[0]
    h = jax.nn.relu(h)
    h = jax.lax.conv_general_dilated(h, w2, (1, 1), 'SAME',
                                     dimension_numbers=dn) + b2[0]
    return h * res_scale + x_nhwc


if __name__ == "__main__":
    # Module-consistent small shapes: batch=2, n_feats=8, spatial=16, kernel=3.
    # (W * C = 128 -> lane-dense blocks.)
    N, C, H, W, K = 2, 8, 16, 16, 3
    res_scale = 1.0

    key = jax.random.PRNGKey(0)
    k_x, k_w1, k_b1, k_w2, k_b2 = jax.random.split(key, 5)

    # PyTorch-convention input: NCHW
    x_nchw = jax.random.normal(k_x, (N, C, H, W), dtype=jnp.float32)

    # Deterministic synthetic parameters (HWIO layout for the kernel).
    w1 = 0.1 * jax.random.normal(k_w1, (K, K, C, C), dtype=jnp.float32)
    b1 = 0.1 * jax.random.normal(k_b1, (1, C), dtype=jnp.float32)
    w2 = 0.1 * jax.random.normal(k_w2, (K, K, C, C), dtype=jnp.float32)
    b2 = 0.1 * jax.random.normal(k_b2, (1, C), dtype=jnp.float32)

    # NCHW -> NHWC for the TPU kernel
    x_nhwc = jnp.transpose(x_nchw, (0, 2, 3, 1))

    out_nhwc = resblock_pallas(x_nhwc, w1, b1, w2, b2, res_scale)
    out_nhwc = jax.block_until_ready(out_nhwc)
    out_nchw = jnp.transpose(out_nhwc, (0, 3, 1, 2))

    # Verify against a pure-JAX f32 reference (same semantics as the module).
    ref_nhwc = resblock_reference(x_nhwc, w1, b1, w2, b2, res_scale)
    ref_nchw = jnp.transpose(ref_nhwc, (0, 3, 1, 2))
    err = float(jnp.max(jnp.abs(out_nchw - ref_nchw)))
    assert out_nchw.shape == (N, C, H, W)
    # bf16 MXU operands vs f32 reference -> relaxed tolerance.
    assert jnp.allclose(out_nchw, ref_nchw, atol=1e-1, rtol=5e-2), err

    print("KERNEL_OK")
</pallas_src>

<mosaic_0001>
module attributes {stable_mosaic.version = 11 : i64} {
  func.func @resblock_kernel(%arg0: i32, %arg1: memref<16x128xf32, #tpu.memory_space<vmem>>, %arg2: memref<384x128xbf16, #tpu.memory_space<vmem>>, %arg3: memref<1x128xf32, #tpu.memory_space<vmem>>, %arg4: memref<384x128xbf16, #tpu.memory_space<vmem>>, %arg5: memref<1x128xf32, #tpu.memory_space<vmem>>, %arg6: memref<16x128xf32, #tpu.memory_space<vmem>>) attributes {dimension_semantics = [#tpu.dimension_semantics<parallel>], iteration_bounds = array<i64: 2>, scalar_prefetch = 0 : i64, scratch_operands = 0 : i64, tpu.core_type = #tpu.core_type<tc>, window_params = [{transform_indices = @transform_0, window_bounds = array<i64: 16, 128>}, {pipeline_mode = #tpu.pipeline_mode<synchronous>, transform_indices = @transform_1, window_bounds = array<i64: 384, 128>}, {pipeline_mode = #tpu.pipeline_mode<synchronous>, transform_indices = @transform_2, window_bounds = array<i64: 1, 128>}, {pipeline_mode = #tpu.pipeline_mode<synchronous>, transform_indices = @transform_3, window_bounds = array<i64: 384, 128>}, {pipeline_mode = #tpu.pipeline_mode<synchronous>, transform_indices = @transform_4, window_bounds = array<i64: 1, 128>}, {transform_indices = @transform_5, window_bounds = array<i64: 16, 128>}]} {
    %c0 = arith.constant 0 : index
    %c0_0 = arith.constant 0 : index
    %0 = vector.load %arg1[%c0, %c0_0] : memref<16x128xf32, #tpu.memory_space<vmem>>, vector<16x128xf32>
    %1 = tpu.iota {dimensions = array<i32: 0>} : vector<16x1xi32>
    %c16_i32 = arith.constant 16 : i32
    %c0_i32 = arith.constant 0 : i32
    %2 = arith.cmpi eq, %c16_i32, %c0_i32 : i32
    %c1_i32 = arith.constant 1 : i32
    %3 = arith.select %2, %c1_i32, %c16_i32 : i32
    %4 = vector.broadcast %3 : i32 to vector<16x1xi32>
    %5 = arith.remsi %1, %4 : vector<16x1xi32>
    %c0_i32_1 = arith.constant 0 : i32
    %6 = vector.broadcast %c0_i32_1 : i32 to vector<16x1xi32>
    %7 = arith.cmpi ne, %5, %6 : vector<16x1xi32>
    %c0_i32_2 = arith.constant 0 : i32
    %8 = vector.broadcast %c0_i32_2 : i32 to vector<16x1xi32>
    %9 = arith.cmpi slt, %5, %8 : vector<16x1xi32>
    %c0_i32_3 = arith.constant 0 : i32
    %10 = arith.cmpi slt, %3, %c0_i32_3 : i32
    %11 = vector.broadcast %10 : i1 to vector<16x1xi1>
    %12 = vector.broadcast %11 : vector<16x1xi1> to vector<16x1xi1>
    %13 = arith.xori %9, %12 : vector<16x1xi1>
    %14 = arith.andi %13, %7 : vector<16x1xi1>
    %15 = vector.broadcast %3 : i32 to vector<16x1xi32>
    %16 = arith.addi %5, %15 : vector<16x1xi32>
    %17 = arith.select %14, %16, %5 : vector<16x1xi1>, vector<16x1xi32>
    %c1_i32_4 = arith.constant 1 : i32
    %18 = tpu.dynamic_rotate %0 by %c1_i32_4 dim 0 : vector<16x128xf32>, i32 -> vector<16x128xf32>
    %c1_i32_5 = arith.constant 1 : i32
    %19 = vector.broadcast %c1_i32_5 : i32 to vector<16x1xi32>
    %20 = arith.cmpi sge, %17, %19 : vector<16x1xi32>
    %c17_i32 = arith.constant 17 : i32
    %21 = vector.broadcast %c17_i32 : i32 to vector<16x1xi32>
    %22 = arith.cmpi slt, %17, %21 : vector<16x1xi32>
    %23 = arith.andi %20, %22 : vector<16x1xi1>
    %cst = arith.constant 0.000000e+00 : f32
    %24 = vector.shape_cast %23 : vector<16x1xi1> to vector<16x1xi1>
    %25 = vector.broadcast %24 : vector<16x1xi1> to vector<16x128xi1>
    %26 = vector.broadcast %cst : f32 to vector<16x128xf32>
    %27 = arith.select %25, %18, %26 : vector<16x128xi1>, vector<16x128xf32>
    %c15_i32 = arith.constant 15 : i32
    %28 = tpu.dynamic_rotate %0 by %c15_i32 dim 0 : vector<16x128xf32>, i32 -> vector<16x128xf32>
    %c-1_i32 = arith.constant -1 : i32
    %29 = vector.broadcast %c-1_i32 : i32 to vector<16x1xi32>
    %30 = arith.cmpi sge, %17, %29 : vector<16x1xi32>
    %c15_i32_6 = arith.constant 15 : i32
    %31 = vector.broadcast %c15_i32_6 : i32 to vector<16x1xi32>
    %32 = arith.cmpi slt, %17, %31 : vector<16x1xi32>
    %33 = arith.andi %30, %32 : vector<16x1xi1>
    %cst_7 = arith.constant 0.000000e+00 : f32
    %34 = vector.shape_cast %33 : vector<16x1xi1> to vector<16x1xi1>
    %35 = vector.broadcast %34 : vector<16x1xi1> to vector<16x128xi1>
    %36 = vector.broadcast %cst_7 : f32 to vector<16x128xf32>
    %37 = arith.select %35, %28, %36 : vector<16x128xi1>, vector<16x128xf32>
    %38 = tpu.concatenate %27, %0, %37 in 1 : vector<16x128xf32>, vector<16x128xf32>, vector<16x128xf32> -> vector<16x384xf32>
    %39 = arith.truncf %38 : vector<16x384xf32> to vector<16x384xbf16>
    %c0_8 = arith.constant 0 : index
    %c0_9 = arith.constant 0 : index
    %40 = vector.load %arg2[%c0_8, %c0_9] : memref<384x128xbf16, #tpu.memory_space<vmem>>, vector<384x128xbf16>
    %cst_10 = arith.constant dense<0.000000e+00> : vector<16x128xf32>
    %41 = tpu.matmul %39, %40, %cst_10 {dimension_numbers = #tpu.dot_dimension_numbers<[1], [0], [0], [1], [0, 0, 1, 1], [], []>} : vector<16x384xbf16>, vector<384x128xbf16>, vector<16x128xf32> -> vector<16x128xf32>
    %c0_11 = arith.constant 0 : index
    %c0_12 = arith.constant 0 : index
    %42 = vector.load %arg3[%c0_11, %c0_12] : memref<1x128xf32, #tpu.memory_space<vmem>>, vector<1x128xf32>
    %43 = vector.broadcast %42 : vector<1x128xf32> to vector<16x128xf32>
    %44 = arith.addf %41, %43 : vector<16x128xf32>
    %cst_13 = arith.constant 0.000000e+00 : f32
    %45 = vector.broadcast %cst_13 : f32 to vector<16x128xf32>
    %46 = arith.maximumf %44, %45 : vector<16x128xf32>
    %c1_i32_14 = arith.constant 1 : i32
    %47 = tpu.dynamic_rotate %46 by %c1_i32_14 dim 0 : vector<16x128xf32>, i32 -> vector<16x128xf32>
    %c1_i32_15 = arith.constant 1 : i32
    %48 = vector.broadcast %c1_i32_15 : i32 to vector<16x1xi32>
    %49 = arith.cmpi sge, %17, %48 : vector<16x1xi32>
    %c17_i32_16 = arith.constant 17 : i32
    %50 = vector.broadcast %c17_i32_16 : i32 to vector<16x1xi32>
    %51 = arith.cmpi slt, %17, %50 : vector<16x1xi32>
    %52 = arith.andi %49, %51 : vector<16x1xi1>
    %cst_17 = arith.constant 0.000000e+00 : f32
    %53 = vector.shape_cast %52 : vector<16x1xi1> to vector<16x1xi1>
    %54 = vector.broadcast %53 : vector<16x1xi1> to vector<16x128xi1>
    %55 = vector.broadcast %cst_17 : f32 to vector<16x128xf32>
    %56 = arith.select %54, %47, %55 : vector<16x128xi1>, vector<16x128xf32>
    %c15_i32_18 = arith.constant 15 : i32
    %57 = tpu.dynamic_rotate %46 by %c15_i32_18 dim 0 : vector<16x128xf32>, i32 -> vector<16x128xf32>
    %c-1_i32_19 = arith.constant -1 : i32
    %58 = vector.broadcast %c-1_i32_19 : i32 to vector<16x1xi32>
    %59 = arith.cmpi sge, %17, %58 : vector<16x1xi32>
    %c15_i32_20 = arith.constant 15 : i32
    %60 = vector.broadcast %c15_i32_20 : i32 to vector<16x1xi32>
    %61 = arith.cmpi slt, %17, %60 : vector<16x1xi32>
    %62 = arith.andi %59, %61 : vector<16x1xi1>
    %cst_21 = arith.constant 0.000000e+00 : f32
    %63 = vector.shape_cast %62 : vector<16x1xi1> to vector<16x1xi1>
    %64 = vector.broadcast %63 : vector<16x1xi1> to vector<16x128xi1>
    %65 = vector.broadcast %cst_21 : f32 to vector<16x128xf32>
    %66 = arith.select %64, %57, %65 : vector<16x128xi1>, vector<16x128xf32>
    %67 = tpu.concatenate %56, %46, %66 in 1 : vector<16x128xf32>, vector<16x128xf32>, vector<16x128xf32> -> vector<16x384xf32>
    %68 = arith.truncf %67 : vector<16x384xf32> to vector<16x384xbf16>
    %c0_22 = arith.constant 0 : index
    %c0_23 = arith.constant 0 : index
    %69 = vector.load %arg4[%c0_22, %c0_23] : memref<384x128xbf16, #tpu.memory_space<vmem>>, vector<384x128xbf16>
    %cst_24 = arith.constant dense<0.000000e+00> : vector<16x128xf32>
    %70 = tpu.matmul %68, %69, %cst_24 {dimension_numbers = #tpu.dot_dimension_numbers<[1], [0], [0], [1], [0, 0, 1, 1], [], []>} : vector<16x384xbf16>, vector<384x128xbf16>, vector<16x128xf32> -> vector<16x128xf32>
    %c0_25 = arith.constant 0 : index
    %c0_26 = arith.constant 0 : index
    %71 = vector.load %arg5[%c0_25, %c0_26] : memref<1x128xf32, #tpu.memory_space<vmem>>, vector<1x128xf32>
    %72 = vector.broadcast %71 : vector<1x128xf32> to vector<16x128xf32>
    %73 = arith.addf %70, %72 : vector<16x128xf32>
    %74 = arith.addf %0, %73 : vector<16x128xf32>
    %c0_27 = arith.constant 0 : index
    %c0_28 = arith.constant 0 : index
    %75 = vector.load %arg6[%c0_27, %c0_28] : memref<16x128xf32, #tpu.memory_space<vmem>>, vector<16x128xf32>
    tpu.vector_store %arg6[%c0_27, %c0_28], %74 {strides = array<i32>} : memref<16x128xf32, #tpu.memory_space<vmem>>, vector<16x128xf32>,
    return
  }
  func.func @transform_0(%arg0: i32) -> (i32, i32) {
    %c0_i32 = arith.constant 0 : i32
    %c0_i32_0 = arith.constant 0 : i32
    return %arg0, %c0_i32 : i32, i32
  }
  func.func @transform_1(%arg0: i32) -> (i32, i32) {
    %c0_i32 = arith.constant 0 : i32
    %c0_i32_0 = arith.constant 0 : i32
    %c0_i32_1 = arith.constant 0 : i32
    return %c0_i32, %c0_i32_0 : i32, i32
  }
  func.func @transform_2(%arg0: i32) -> (i32, i32) {
    %c0_i32 = arith.constant 0 : i32
    %c0_i32_0 = arith.constant 0 : i32
    %c0_i32_1 = arith.constant 0 : i32
    return %c0_i32, %c0_i32_0 : i32, i32
  }
  func.func @transform_3(%arg0: i32) -> (i32, i32) {
    %c0_i32 = arith.constant 0 : i32
    %c0_i32_0 = arith.constant 0 : i32
    %c0_i32_1 = arith.constant 0 : i32
    return %c0_i32, %c0_i32_0 : i32, i32
  }
  func.func @transform_4(%arg0: i32) -> (i32, i32) {
    %c0_i32 = arith.constant 0 : i32
    %c0_i32_0 = arith.constant 0 : i32
    %c0_i32_1 = arith.constant 0 : i32
    return %c0_i32, %c0_i32_0 : i32, i32
  }
  func.func @transform_5(%arg0: i32) -> (i32, i32) {
    %c0_i32 = arith.constant 0 : i32
    %c0_i32_0 = arith.constant 0 : i32
    return %arg0, %c0_i32 : i32, i32
  }
}

</mosaic_0001>

<bundles_post_ra>
// kernel: tpu_custom_call.1
= control target key start
LH: loop header
LB: loop body
LE: loop exit
PB: predicated region body
PF: predicated region fallthrough
CT: control target
= control target key end

     0   :  { %10 = vsyncpa [#allocation3], 0  ;;  %s1857_s0 = inlined_call_operand.hbm [shape: f32[32,128], index: 0, kind: input, shape index: {}]   ;;  %s1858_s1 = inlined_call_operand.hbm [shape: bf16[384,128], index: 1, kind: input, shape index: {}]   ;;  %s1859_s2 = inlined_call_operand.vmem [shape: f32[1,128], index: 2, kind: input, shape index: {}]   ;;  %s1860_s3 = inlined_call_operand.hbm [shape: bf16[384,128], index: 3, kind: input, shape index: {}]   ;;  %s1861_s4 = inlined_call_operand.vmem [shape: f32[1,128], index: 4, kind: input, shape index: {}]   ;;  %s1862_s5 = inlined_call_operand.hbm [shape: f32[32,128], index: 5, kind: output, shape index: {}]  }
   0x1   :  { %12 = vsyncpa [#allocation3 + $0x1], 0 }
   0x2   :  { %13 = vsyncpa [#allocation6], 0 }
   0x3   :  { %14 = vsyncpa [#allocation4], 0 }
   0x4   :  { %16 = vsyncpa [#allocation4 + $0x1], 0  ;;  %s1539_s18 = smov 0   ;;  %s1541_s19 = smov 0  }
   0x5   :  { %s1543_s20 = smov 0   ;;  %s1545_s21 = smov 0  }
   0x6 LB: > { %s1560_s22 = sadd.s32 4294967295, %s1494_s21   ;;  %s1030_s23 = sadd.s32 4294967294, %s1494_s21   ;;  %s1494_s21 = sphi %s1545_s21, %s1886_s21   ;;  %s1490_s20 = sphi %s1543_s20, %s1885_s20   ;;  %s1486_s19 = sphi %s1541_s19, %s1884_s19   ;;  %s1482_s18 = sphi %s1539_s18, %s1883_s18  }
   0x7   : > { %p42_p0 = scmp.ne.s32.totalorder %s1486_s19, %s1482_s18  ;;  %p1863_p1 = scmp.eq.s32.totalorder %s1560_s22, 0 }
   0x8   : > { %p156_p3 = scmp.eq.s32.totalorder %s1030_s23, 1  ;;  %p1031_p5 = scmp.ge.s32.totalorder %s1494_s21, 1 }
   0x9   : > { %p1569_p4 = por %p1863_p1, %p42_p0  ;;  %p163_p7 = scmp.lt.s32.totalorder %s1494_s21, 3 }
   0xa   : > { %p1574_p6 = por %p156_p3, %p42_p0  ;;  %s1496_s27 = smov [#allocation5]  }
   0xb   : > { %s1866_s24 = scalar_select %p1569_p4, 1, 0 }
   0xc   : > { %s1867_s25 = scalar_select %p1574_p6, 1, 0 }
   0xd   : > { %p1579_p8 = pnand %p1031_p5, %p163_p7  ;;  %s175_s28 = sshll.u32 %s1496_s27, 4  ;;  %s1583_s28 = int_to_ptr.vmem [resolvable:$true] %s175_s28 }
   0xe   : > { %s1497_s30 = smov [#allocation7]   ;;  %s1338_s9 = scalar_lea.hbm %s1858_s1, 3072 }
   0xf   : > { %p1226_p9 = pneg %p1579_p8  ;;  %s191_s6 = sshll.u32 %s1497_s30, 4  ;;  %s1594_s6 = int_to_ptr.vmem [resolvable:$true] %s191_s6 }
  0x10   : > { %p1339_p12 = scmp.ne.s32.totalorder %s1858_s1, %s1338_s9  ;;  %p1345_p5 = scmp.lt.u32.totalorder %s1338_s9, %s1858_s1 }
  0x11   : > { %p1590_p11 = pnand %p1226_p9, %p1863_p1 }
  0x13   : > { %p1340_p13 = pneg %p1590_p11 }
  0x15   : > { %p1341_p0 = pnand %p1340_p13, %p1339_p12 }
  0x17   : > { %p1342_p3 = pneg %p1341_p0 }
  0x19   : > { %p1347_p7 = pnand %p1345_p5, %p1342_p3 }
  0x1b   : > { %1350 = shalt.err (!%p1347_p7)
}
  0x1c   : > { %s1351_s14 = scalar_lea.vmem %s1583_s28, 3072  ;;  %p1359_p2 = scmp.lt.s32.totalorder %s1583_s28, %s1583_s28 }
  0x1d   : > { %p1352_p9 = scmp.ne.s32.totalorder %s1583_s28, %s1351_s14  ;;  %p1360_p12 = scmp.lt.s32.totalorder %s1351_s14, %s1351_s14 }
  0x1f   : > { %p1354_p10 = pnand %p1352_p9, %p1340_p13  ;;  %p1361_p0 = por %p1360_p12, %p1359_p2 }
  0x21   : > { %p1355_p1 = pneg %p1354_p10 }
  0x23   : > { %p1362_p6 = pnand %p1361_p0, %p1355_p1 }
  0x25   : > { %1365 = shalt.err (!%p1362_p6)
}
  0x26   : > { %s1498_s15 = smov 64   ;;  %s1499_s16 = smov 4  }
  0x27   : > { %1229 = dma.hbm_to_vmem [thread:$0]  (!%p1590_p11), %s1858_s1, 3072, %s1583_s28, [#allocation6], %s1498_s15, %s1498_s15, %s1499_s16  }
  0x28   : > { %s1366_s7 = scalar_lea.hbm %s1860_s3, 3072 }
  0x29   : > { %p1367_p2 = scmp.ne.s32.totalorder %s1860_s3, %s1366_s7  ;;  %p1373_p10 = scmp.lt.u32.totalorder %s1366_s7, %s1860_s3 }
  0x2b   : > { %p1369_p1 = pnand %p1367_p2, %p1340_p13 }
  0x2d   : > { %p1370_p6 = pneg %p1369_p1 }
  0x2f   : > { %p1375_p3 = pnand %p1373_p10, %p1370_p6 }
  0x31   : > { %1378 = shalt.err (!%p1375_p3)
}
  0x32   : > { %s1379_s28 = scalar_lea.vmem %s1594_s6, 3072  ;;  %p1387_p12 = scmp.lt.s32.totalorder %s1594_s6, %s1594_s6 }
  0x33   : > { %p1380_p5 = scmp.ne.s32.totalorder %s1594_s6, %s1379_s28  ;;  %p1388_p0 = scmp.lt.s32.totalorder %s1379_s28, %s1379_s28 }
  0x35   : > { %p1382_p7 = pnand %p1380_p5, %p1340_p13  ;;  %p1389_p2 = por %p1388_p0, %p1387_p12 }
  0x37   : > { %p1383_p9 = pneg %p1382_p7 }
  0x39   : > { %p1390_p1 = pnand %p1389_p2, %p1383_p9 }
  0x3b   : > { %1393 = shalt.err (!%p1390_p1)
}
  0x3c   : > { %1232 = dma.hbm_to_vmem [thread:$0]  (!%p1590_p11), %s1860_s3, 3072, %s1594_s6, [#allocation6], %s1498_s15, %s1498_s15, %s1499_s16  }
  0x3d   : > { %s1649_s14 = sadd.s32 1, %s1494_s21   ;;  %s29_s29 = sadd.s32 1, %s1490_s20 }
  0x3e   : > { %s26_s17 = ssub.s32 %s1494_s21, %s1649_s14  ;;  %p36_p13 = scmp.ne.s32.totalorder %s1490_s20, %s1486_s19 }
  0x3f   : > { %p27_p6 = scmp.eq.s32.totalorder %s26_s17, 0  ;;  %p37_p10 = scmp.eq.s32.totalorder %s1494_s21, 0 }
  0x40   : > { %p1870_p3 = scmp.eq.s32.totalorder %s1560_s22, 1  ;;  %p1243_p7 = scmp.lt.s32.totalorder %s1494_s21, 2 }
  0x41   : > { %s1665_s27 = scalar_select %p27_p6, %s1490_s20, %s29_s29  }
  0x42   : > { %p1659_p5 = por %p1870_p3, %p36_p13  ;;  %p38_p9 = por %p37_p10, %p36_p13 }
  0x43   : > { %s208_s30 = sand.u32 1, %s1490_s20   ;;  %s1110_s6 = sshll.u32 %s1494_s21, 8 }
  0x44   : > { %s1871_s23 = scalar_select %p1659_p5, 1, 0 }
  0x45   : > { %s1035_s7 = sshll.u32 %s208_s30, 4  ;;  %s1672_s8 = scalar_lea.hbm %s1857_s0, %s1110_s6 }
  0x46   : > { %s212_s9 = scalar_lea.vmem [#allocation2], %s1035_s7  ;;  %p1676_p11 = pnand %p1243_p7, %p38_p9 }
  0x47   : > { %s219_s10 = sshll.u32 %s212_s9, 4  ;;  %s1680_s28 = scalar_lea.sflag [#allocation3], %s208_s30  ;;  %s1674_s10 = int_to_ptr.vmem [resolvable:$true] %s219_s10 }
  0x48   : > { %s1394_s12 = scalar_lea.hbm %s1672_s8, 256  ;;  %p1396_p0 = pneg %p1676_p11 }
  0x49   : > { %p1395_p12 = scmp.ne.s32.totalorder %s1672_s8, %s1394_s12  ;;  %s1399_s17 = scalar_lea.hbm %s1857_s0, 512 }
  0x4a   : > { %p1400_p13 = scmp.lt.u32.totalorder %s1672_s8, %s1857_s0  ;;  %p1401_p6 = scmp.lt.u32.totalorder %s1399_s17, %s1394_s12 }
  0x4b   : > { %p1397_p2 = pnand %p1396_p0, %p1395_p12  ;;  %p1403_p3 = scmp.lt.u32.totalorder %s1394_s12, %s1672_s8 }
  0x4c   : > { %p1402_p10 = por %p1401_p6, %p1400_p13 }
  0x4d   : > { %p1398_p1 = pneg %p1397_p2 }
  0x4e   : > { %p1404_p7 = por %p1403_p3, %p1402_p10 }
  0x50   : > { %p1405_p9 = pnand %p1404_p7, %p1398_p1 }
  0x52   : > { %1408 = shalt.err (!%p1405_p9)
}
  0x53   : > { %s1409_s30 = scalar_lea.vmem %s1674_s10, 256  ;;  %s1500_s15 = smov [#allocation2]  }
  0x54   : > { %p1410_p12 = scmp.ne.s32.totalorder %s1674_s10, %s1409_s30  ;;  %s1414_s16 = sshll.u32 %s1500_s15, 4  ;;  %s1415_s16 = int_to_ptr.vmem [resolvable:$false] %s1414_s16 }
  0x55   : > { %s1416_s9 = scalar_lea.vmem %s1415_s16, 512  ;;  %p1417_p4 = scmp.lt.s32.totalorder %s1674_s10, %s1415_s16 }
  0x56   : > { %p1412_p2 = pnand %p1410_p12, %p1396_p0  ;;  %p1418_p13 = scmp.lt.s32.totalorder %s1416_s9, %s1409_s30 }
  0x58   : > { %p1413_p5 = pneg %p1412_p2  ;;  %p1419_p6 = por %p1418_p13, %p1417_p4 }
  0x5a   : > { %p1420_p10 = pnand %p1419_p6, %p1413_p5 }
  0x5c   : > { %1423 = shalt.err (!%p1420_p10)
}
  0x5d   : > { %s1501_s12 = smov 128   ;;  %s1502_s13 = smov 8  }
  0x5e   : > { %1236 = dma.hbm_to_vmem [thread:$0]  (!%p1676_p11), %s1672_s8, 256, %s1674_s10, %s1680_s28, %s1501_s12, %s1501_s12, %s1502_s13  }
  0x5f   : > { %231 = sbr.rel (%p1579_p8) target bundleno = 606 (0x25e), region = 40  ;;  %s1711_s29 = sand.u32 (!%p1579_p8), 1, %s1486_s19  }
  0x60   : > { %s1039_s17 = sshll.u32 (!%p1579_p8), %s1711_s29, 4  ;;  %s234_s7 = scalar_lea.sflag (!%p1579_p8), [#allocation3], %s1711_s29 }
  0x61   : > { %s1717_s6 = scalar_lea.vmem (!%p1579_p8), [#allocation2], %s1039_s17  ;;  %p1873_p4 = scmp.ne.s32.totalorder (!%p1579_p8), %s1866_s24, 0 }
  0x66   : > { %1469 = dma.done.wait (%p1873_p4), %s234_s7, 256  }
  0x67   : > { %1471 = vsyncadd (%p1873_p4), %s234_s7, 4294967040  ;;  %p1874_p5 = scmp.eq.s32.totalorder %s1560_s22, 0 }
  0x69   : > { %1473 = dma.done.wait (%p1874_p5), [#allocation6], 6144   ;;  %p1875_p8 = pmov %p1874_p5 }
  0x6a   : > { %v1503_v0 = vmov 0.0   ;;  %vm1504_vm0 = vmmov 0   ;;  %v1290_v1 = vld [vmem:[#allocation5 + $0x40] sm:$0xff]   ;;  %v1293_v4 = vld [vmem:[#allocation5 + $0x48] sm:$0xff]   ;;  %v1296_v7 = vld [vmem:[#allocation5 + $0x50] sm:$0xff]   ;;  %v277_v12 = vlaneseq  ;;  %vm1505_vm4 = vmmov 1  }
  0x6b   : > { %1475 = vsyncadd (%p1875_p8), [#allocation6], 4294961152  ;;  %1174 = vmatprep.subr.bf16.mxu1 %v1503_v0  ;;  %1190 = vmatprep.mubr.msk.bf16.mxu1 %vm1504_vm0, %v1503_v0  ;;  %v1291_v2 = vld [vmem:[#allocation5] sm:$0xff]   ;;  %v1294_v5 = vld [vmem:[#allocation5 + $0x8] sm:$0xff]   ;;  %s271_s11 = scalar_lea.vmem [#allocation8], %s1039_s17  ;;  %s1111_s30 = sshll.u32 %s1560_s22, 8 }
  0x6c   : > { %1112 = vmatprep.subr.bf16.mxu0 %v1290_v1  ;;  %v1292_v3 = vld [vmem:[#allocation5 + $0x80] sm:$0xff]   ;;  %v1295_v6 = vld [vmem:[#allocation5 + $0x88] sm:$0xff]   ;;  %v1297_v8 = vld [vmem:[#allocation5 + $0x10] sm:$0xff]   ;;  %v1733_v16 = vshrl.u32 %v277_v12, 7  ;;  %s938_s28 = sshll.u32 %s271_s11, 4  ;;  %s1810_s9 = scalar_lea.hbm %s1862_s5, %s1111_s30  ;;  %s1812_s28 = int_to_ptr.vmem [resolvable:$true] %s938_s28 }
  0x6d   : > { %1113 = vmatpush3.bf16.msra.mxu0 %v1291_v2  ;;  %1175 = vmatpush3.bf16.msra.mxu1 %v1292_v3  ;;  %v1298_v9 = vld [vmem:[#allocation5 + $0x90] sm:$0xff]   ;;  %v1299_v10 = vld [vmem:[#allocation5 + $0x58] sm:$0xff]   ;;  %v1302_v14 = vld [vmem:[#allocation5 + $0x60] sm:$0xff]   ;;  %s925_s12 = scalar_lea.sflag [#allocation4], %s1711_s29  ;;  %s1424_s13 = scalar_lea.vmem %s1812_s28, 256 }
  0x6e   : > { %1114 = vmatprep.subr.bf16.mxu0 %v1293_v4  ;;  %1176 = vmatprep.subr.bf16.mxu1 %v1503_v0  ;;  %v1300_v11 = vld [vmem:[#allocation5 + $0x18] sm:$0xff]   ;;  %v1303_v15 = vld [vmem:[#allocation5 + $0x20] sm:$0xff]   ;;  %v1305_v18 = vld [vmem:[#allocation5 + $0x68] sm:$0xff]   ;;  %v279_v20 = vadd.s32 8, %v1733_v16  ;;  %v284_v22 = vand.u32 15, %v1733_v16  ;;  %vm306_vm1 = vcmp.lt.s32.totalorder %v1733_v16, 1  ;;  %p1425_p11 = scmp.ne.s32.totalorder %s1812_s28, %s1424_s13 }
  0x6f   : > { %v1301_v13 = vld [vmem:[#allocation5 + $0x98] sm:$0xff]   ;;  %v1304_v17 = vld [vmem:[#allocation5 + $0xa0] sm:$0xff]   ;;  %v1306_v19 = vld [vmem:[#allocation5 + $0x28] sm:$0xff]   ;;  %vm323_vm3 = vcmp.lt.s32.totalorder %v1733_v16, 7  ;;  %p1880_p0 = scmp.ne.s32.totalorder %s1871_s23, 0  ;;  %s1506_s22 = smov [#allocation8]  }
  0x70   : > { %v1307_v21 = vld [vmem:[#allocation5 + $0xa8] sm:$0xff]   ;;  %v1308_v23 = vld [vmem:[#allocation5 + $0x70] sm:$0xff]   ;;  %v1311_v26 = vld [vmem:[#allocation5 + $0x78] sm:$0xff]   ;;  %v291_v27 = vand.u32 15, %v279_v20  ;;  %vm309_vm2 = vcmp.ge.s32.totalorder %v284_v22, 1  ;;  %s1428_s17 = sshll.u32 %s1506_s22, 4  ;;  %s1429_s17 = int_to_ptr.vmem [resolvable:$false] %s1428_s17 }
  0x71   : > { %1115 = vmatpush3.bf16.msra.mxu0 %v1294_v5  ;;  %1177 = vmatpush3.bf16.msra.mxu1 %v1295_v6  ;;  %v1309_v24 = vld [vmem:[#allocation5 + $0x30] sm:$0xff]   ;;  %v1743_v29 = vld [vmem:[%s1717_s6 + $0x8] sm:$0xff]  ;;  %vm1754_vm5 = vmpackc.low %vm1505_vm4, %vm309_vm2  ;;  %p1426_p1 = pnand %p1425_p11, %p1880_p0  ;;  %s1430_s7 = scalar_lea.vmem %s1429_s17, 512 }
  0x72   : > { %1116 = vmatprep.subr.bf16.mxu0 %v1296_v7  ;;  %1178 = vmatprep.subr.bf16.mxu1 %v1503_v0  ;;  %v1310_v25 = vld [vmem:[#allocation5 + $0xb0] sm:$0xff]   ;;  %v305_v31 = vrot.slane %v1743_v29, 7  ;;  %v322_v33 = vrot.slane %v1743_v29, 1  ;;  %v1312_v34 = vld [vmem:[#allocation5 + $0x38] sm:$0xff]   ;;  %vm329_vm6 = vcmp.lt.s32.totalorder %v291_v27, 15  ;;  %v1314_v42 = vld [vmem:[#allocation7 + $0x40] sm:$0xff]   ;;  %p1431_p7 = scmp.lt.s32.totalorder %s1812_s28, %s1429_s17  ;;  %p1432_p9 = scmp.lt.s32.totalorder %s1430_s7, %s1424_s13 }
  0x73   : > { %v1740_v28 = vld [vmem:[%s1717_s6] sm:$0xff]  ;;  %v1313_v37 = vld [vmem:[#allocation5 + $0xb8] sm:$0xff]   ;;  %vm1767_vm7 = vmpackc.low %vm329_vm6, %vm1505_vm4  ;;  %p1427_p3 = pneg %p1426_p1 }
  0x74   : > { %v304_v30 = vrot.slane %v1740_v28, 7  ;;  %v321_v32 = vrot.slane %v1740_v28, 1  ;;  %v339_v35 = vpack.c.bf16 %v1743_v29, %v1740_v28  ;;  %v1315_v45 = vld [vmem:[#allocation7] sm:$0xff]   ;;  %v1317_v48 = vld [vmem:[#allocation7 + $0x48] sm:$0xff]   ;;  %v1320_v51 = vld [vmem:[#allocation7 + $0x50] sm:$0xff]   ;;  %p1433_p12 = por %p1432_p9, %p1431_p7 }
  0x75   : > { %1117 = vmatpush3.bf16.msra.mxu0 %v1297_v8  ;;  %1179 = vmatpush3.bf16.msra.mxu1 %v1298_v9  ;;  %v1316_v47 = vld [vmem:[#allocation7 + $0x80] sm:$0xff]   ;;  %v1318_v49 = vld [vmem:[#allocation7 + $0x8] sm:$0xff]   ;;  %v1321_v52 = vld [vmem:[#allocation7 + $0x10] sm:$0xff]  }
  0x76   : > { %1118 = vmatprep.subr.bf16.mxu0 %v1299_v10  ;;  %1180 = vmatprep.subr.bf16.mxu1 %v1503_v0  ;;  %v307_v38 = vsel %vm306_vm1, %v304_v30, %v305_v31  ;;  %v308_v39 = vsel %vm306_vm1, %v305_v31, %v304_v30  ;;  %v324_v40 = vsel %vm323_vm3, %v321_v32, %v322_v33  ;;  %v1319_v50 = vld [vmem:[#allocation7 + $0x88] sm:$0xff]   ;;  %v1322_v53 = vld [vmem:[#allocation7 + $0x90] sm:$0xff]   ;;  %v1323_v54 = vld [vmem:[#allocation7 + $0x58] sm:$0xff]   ;;  %p1434_p2 = pnand %p1433_p12, %p1427_p3 }
  0x77   : > { %572 = vmatprep.mubr.bf16.mxu0 %v339_v35  ;;  %v325_v41 = vsel %vm323_vm3, %v322_v33, %v321_v32  ;;  %v1069_v44 = vpack.c.bf16 %v307_v38, %v308_v39  ;;  %v1324_v55 = vld [vmem:[#allocation7 + $0x18] sm:$0xff]   ;;  %v1326_v57 = vld [vmem:[#allocation7 + $0x60] sm:$0xff]   ;;  %v1329_v60 = vld [vmem:[#allocation7 + $0x68] sm:$0xff]  }
  0x78   : > { %v1072_v46 = vpack.c.bf16 %v325_v41, %v324_v40  ;;  %v1325_v56 = vld [vmem:[#allocation7 + $0x98] sm:$0xff]   ;;  %v1327_v58 = vld [vmem:[#allocation7 + $0x20] sm:$0xff]   ;;  %v1330_v61 = vld [vmem:[#allocation7 + $0x28] sm:$0xff]  }
  0x79   : > { %1119 = vmatpush3.bf16.msra.mxu0 %v1300_v11  ;;  %1181 = vmatpush3.bf16.msra.mxu1 %v1301_v13  ;;  %v1328_v59 = vld [vmem:[#allocation7 + $0xa0] sm:$0xff]   ;;  %v1331_v62 = vld [vmem:[#allocation7 + $0xa8] sm:$0xff]   ;;  %v1332_v63 = vld [vmem:[#allocation7 + $0x70] sm:$0xff]  }
  0x7a   : > { %1120 = vmatprep.subr.bf16.mxu0 %v1302_v14  ;;  %1182 = vmatprep.subr.bf16.mxu1 %v1503_v0  ;;  %v1333_v1 = vld [vmem:[#allocation7 + $0x30] sm:$0xff]   ;;  %v1335_v3 = vld [vmem:[#allocation7 + $0x78] sm:$0xff]   ;;  %v1043_v8 = vld [vmem:[%s1859_s2] ss:$0 sm:$0xff] }
  0x7b   : > { %v1334_v2 = vld [vmem:[#allocation7 + $0xb0] sm:$0xff]   ;;  %v1336_v4 = vld [vmem:[#allocation7 + $0x38] sm:$0xff]   ;;  %v1074_v39 = vld [vmem:[%s1861_s4] ss:$0 sm:$0xff] }
  0x7c   : > { %v1337_v5 = vld [vmem:[#allocation7 + $0xb8] sm:$0xff]  }
  0x7d   : > { %1121 = vmatpush3.bf16.msra.mxu0 %v1303_v15  ;;  %1183 = vmatpush3.bf16.msra.mxu1 %v1304_v17 }
  0x7e   : > { %1122 = vmatprep.subr.bf16.mxu0 %v1305_v18  ;;  %1184 = vmatprep.subr.bf16.mxu1 %v1503_v0 }
  0x81   : > { %1123 = vmatpush3.bf16.msra.mxu0 %v1306_v19  ;;  %1185 = vmatpush3.bf16.msra.mxu1 %v1307_v21 }
  0x82   : > { %1124 = vmatprep.subr.bf16.mxu0 %v1308_v23  ;;  %1186 = vmatprep.subr.bf16.mxu1 %v1503_v0 }
  0x85   : > { %1125 = vmatpush3.bf16.msra.mxu0 %v1309_v24  ;;  %1187 = vmatpush3.bf16.msra.mxu1 %v1310_v25 }
  0x86   : > { %1126 = vmatprep.subr.bf16.mxu0 %v1311_v26  ;;  %1188 = vmatprep.subr.bf16.mxu1 %v1503_v0 }
  0x89   : > { %1127 = vmatpush3.bf16.msra.mxu0 %v1312_v34  ;;  %1189 = vmatpush3.bf16.msra.mxu1 %v1313_v37 }
  0x8a   : > { %1143 = vmatprep.subr.bf16.mxu0 %v1314_v42  ;;  %1194 = vmatprep.subr.bf16.mxu1 %v1503_v0 }
  0x8c   : > { %1070 = vmatmul.mubr.msk.bf16.vlgmr.msra.gmra.mrb[0].mxu0 %vm1754_vm5, %v1069_v44  ;;  %1191 = vmatmul.mubr.msk.bf16.vlgmr.msra.gmra.mrb[0].mxu1 %vm1767_vm7, %v1072_v46 }
  0x8d   : > { %1144 = vmatpush3.bf16.msra.mxu0 %v1315_v45  ;;  %1195 = vmatpush3.bf16.msra.mxu1 %v1316_v47 }
  0x8e   : > { %1145 = vmatprep.subr.bf16.mxu0 %v1317_v48  ;;  %1196 = vmatprep.subr.bf16.mxu1 %v1503_v0 }
  0x8f   : > { %1210 = vmatprep.mubr.msk.bf16.mxu1 %vm1504_vm0, %v1503_v0 }
  0x91   : > { %1146 = vmatpush3.bf16.msra.mxu0 %v1318_v49  ;;  %1197 = vmatpush3.bf16.msra.mxu1 %v1319_v50 }
  0x92   : > { %1147 = vmatprep.subr.bf16.mxu0 %v1320_v51  ;;  %1198 = vmatprep.subr.bf16.mxu1 %v1503_v0 }
  0x95   : > { %1148 = vmatpush3.bf16.msra.mxu0 %v1321_v52  ;;  %1199 = vmatpush3.bf16.msra.mxu1 %v1322_v53 }
  0x96   : > { %1149 = vmatprep.subr.bf16.mxu0 %v1323_v54  ;;  %1200 = vmatprep.subr.bf16.mxu1 %v1503_v0 }
  0x99   : > { %1150 = vmatpush3.bf16.msra.mxu0 %v1324_v55  ;;  %1201 = vmatpush3.bf16.msra.mxu1 %v1325_v56 }
  0x9a   : > { %1202 = vmatprep.subr.bf16.mxu1 %v1503_v0  ;;  %1151 = vmatprep.subr.bf16.mxu0 %v1326_v57 }
  0x9d   : > { %1152 = vmatpush3.bf16.msra.mxu0 %v1327_v58  ;;  %1203 = vmatpush3.bf16.msra.mxu1 %v1328_v59 }
  0x9e   : > { %1204 = vmatprep.subr.bf16.mxu1 %v1503_v0  ;;  %1153 = vmatprep.subr.bf16.mxu0 %v1329_v60 }
  0xa1   : > { %1154 = vmatpush3.bf16.msra.mxu0 %v1330_v61  ;;  %1205 = vmatpush3.bf16.msra.mxu1 %v1331_v62 }
  0xa2   : > { %1206 = vmatprep.subr.bf16.mxu1 %v1503_v0  ;;  %1155 = vmatprep.subr.bf16.mxu0 %v1332_v63 }
  0xa5   : > { %1156 = vmatpush3.bf16.msra.mxu0 %v1333_v1  ;;  %1207 = vmatpush3.bf16.msra.mxu1 %v1334_v2 }
  0xa6   : > { %1208 = vmatprep.subr.bf16.mxu1 %v1503_v0  ;;  %1157 = vmatprep.subr.bf16.mxu0 %v1335_v3 }
  0xa9   : > { %1158 = vmatpush3.bf16.msra.mxu0 %v1336_v4  ;;  %1209 = vmatpush3.bf16.msra.mxu1 %v1337_v5 }
 0x15f   : > { %v1128_v6 = vpop.f32.mrb[0].mxu0  ;;  %v615_v9 = vpop.f32.mrb[0].mxu1 }
 0x160   : > { %v1129_v7 = vpop.f32.mrb[1].mxu0  ;;  %v1192_v12 = vpop.f32.mrb[1].mxu1 }
 0x161   : > { %v1130_v10 = vadd.f32 %v1129_v7, %v1128_v6  ;;  %v1131_v11 = vpop.f32.mrb[2].mxu0  ;;  %v618_v14 = vpop.f32.mrb[2].mxu1 }
 0x162   : > { %v1132_v13 = vpop.f32.mrb[3].mxu0  ;;  %v1193_v0 = vpop.f32.mrb[3].mxu1 }
 0x163   : > { %v575_v15 = vadd.f32 %v1130_v10, %v1043_v8  ;;  %v1133_v17 = vadd.f32 %v1132_v13, %v1131_v11 }
 0x165   : > { %v616_v18 = vadd.f32 %v615_v9, %v575_v15  ;;  %v578_v19 = vadd.f32 %v1133_v17, %v1043_v8 }
 0x167   : > { %v622_v20 = vmax.f32 %v616_v18, 0.0  ;;  %v619_v21 = vadd.f32 %v618_v14, %v578_v19 }
 0x169   : > { %v623_v22 = vmax.f32 %v619_v21, 0.0  ;;  %v624_v23 = vrot.slane %v622_v20, 7  ;;  %v630_v24 = vrot.slane %v622_v20, 1 }
 0x16b   : > { %v625_v25 = vrot.slane %v623_v22, 7  ;;  %v631_v26 = vrot.slane %v623_v22, 1  ;;  %v637_v27 = vpack.c.bf16 %v623_v22, %v622_v20 }
 0x16d   : > { %v626_v30 = vsel %vm306_vm1, %v624_v23, %v625_v25  ;;  %v627_v31 = vsel %vm306_vm1, %v625_v25, %v624_v23  ;;  %v632_v32 = vsel %vm323_vm3, %v630_v24, %v631_v26  ;;  %v633_v33 = vsel %vm323_vm3, %v631_v26, %v630_v24  ;;  %870 = vmatprep.mubr.bf16.mxu0 %v637_v27 }
 0x16e   : > { %v1100_v34 = vpack.c.bf16 %v626_v30, %v627_v31  ;;  %v1103_v35 = vpack.c.bf16 %v633_v33, %v632_v32 }
 0x170   : > { %1101 = vmatmul.mubr.msk.bf16.vlgmr.msra.gmra.mrb[4].mxu0 %vm1754_vm5, %v1100_v34  ;;  %1211 = vmatmul.mubr.msk.bf16.vlgmr.msra.gmra.mrb[4].mxu1 %vm1767_vm7, %v1103_v35 }
 0x243   : > { %v1159_v37 = vpop.f32.mrb[4].mxu0  ;;  %v913_v38 = vpop.f32.mrb[4].mxu1 }
 0x244   : > { %v1160_v40 = vpop.f32.mrb[5].mxu0  ;;  %v1212_v16 = vpop.f32.mrb[5].mxu1 }
 0x245   : > { %v1161_v41 = vadd.f32 %v1160_v40, %v1159_v37  ;;  %v1162_v42 = vpop.f32.mrb[6].mxu0  ;;  %v916_v44 = vpop.f32.mrb[6].mxu1 }
 0x246   : > { %v1163_v45 = vpop.f32.mrb[7].mxu0  ;;  %v1213_v36 = vpop.f32.mrb[7].mxu1 }
 0x247   : > { %v873_v46 = vadd.f32 %v1161_v41, %v1074_v39  ;;  %v1164_v47 = vadd.f32 %v1163_v45, %v1162_v42 }
 0x249   : > { %v914_v43 = vadd.f32 %v913_v38, %v873_v46  ;;  %v876_v48 = vadd.f32 %v1164_v47, %v1074_v39 }
 0x24b   : > { %v920_v49 = vadd.f32 %v914_v43, %v1740_v28  ;;  %v917_v50 = vadd.f32 %v916_v44, %v876_v48 }
 0x24d   : > { %922 = vst [vmem:[%s271_s11] sm:$0xff] %v920_v49  ;;  %v921_v51 = vadd.f32 %v917_v50, %v1743_v29 }
 0x24f   : > { %923 = vst [vmem:[%s271_s11 + $0x8] sm:$0xff] %v921_v51 }
 0x250   : > { %1437 = shalt.err (!%p1434_p2)
}
 0x251   : > { %s1438_s6 = scalar_lea.hbm %s1810_s9, 256  ;;  %s1442_s8 = scalar_lea.hbm %s1862_s5, 512 }
 0x252   : > { %p1439_p13 = scmp.ne.s32.totalorder %s1810_s9, %s1438_s6  ;;  %p1443_p4 = scmp.lt.u32.totalorder %s1810_s9, %s1862_s5 }
 0x253   : > { %p1444_p5 = scmp.lt.u32.totalorder %s1442_s8, %s1438_s6  ;;  %p1446_p11 = scmp.lt.u32.totalorder %s1438_s6, %s1810_s9 }
 0x254   : > { %p1440_p6 = pnand %p1439_p13, %p1880_p0 }
 0x255   : > { %p1445_p8 = por %p1444_p5, %p1443_p4 }
 0x256   : > { %p1441_p10 = pneg %p1440_p6 }
 0x257   : > { %p1447_p1 = por %p1446_p11, %p1445_p8 }
 0x259   : > { %p1448_p3 = pnand %p1447_p1, %p1441_p10 }
 0x25b   : > { %1451 = shalt.err (!%p1448_p3)
}
 0x25c   : > { %s1507_s30 = smov 128   ;;  %s1508_s15 = smov 8  }
 0x25d   : > { %1224 = dma.vmem_to_hbm [thread:$0]  (%p1880_p0), %s1812_s28, 256, %s1810_s9, %s925_s12, %s1507_s30, %s1507_s30, %s1508_s15  }
 0x25e PF: > { %s953_s16 = sand.u32 1, %s1482_s18   ;;  %p1881_p7 = scmp.ne.s32.totalorder %s1867_s25, 0 }
 0x25f   : > { %p1882_p9 = scmp.ge.s32.totalorder %s1494_s21, 2  ;;  %s954_s13 = scalar_lea.sflag [#allocation4], %s953_s16 }
 0x261   : > { %p1238_p12 = pnand %p1882_p9, %p1881_p7 }
 0x263   : > { %1477 = dma.done.wait (!%p1238_p12), %s954_s13, 256  }
 0x264   : > { %1479 = vsyncadd (!%p1238_p12), %s954_s13, 4294967040  ;;  %p19_p2 = scmp.ge.s32.totalorder %s1649_s14, 4   ;;  %s1883_s18 = smov %s1486_s19 }
 0x265   : > { %s1884_s19 = smov %s1490_s20  ;;  %s1885_s20 = smov %s1665_s27 }
 0x266   : > { %s1886_s21 = smov %s1649_s14  ;;  %21 = sbr.rel (!%p19_p2) target bundleno = 6 (0x6), region = 93 }
 0x26d   :  { %959 = vsyncpa [#allocation3], 1 }
 0x26e   :  { %961 = vsyncpa [#allocation3 + $0x1], 1 }
 0x26f   :  { %962 = vsyncpa [#allocation6], 1 }
 0x270   :  { %963 = vsyncpa [#allocation4], 1 }
 0x271   :  { %965 = vsyncpa [#allocation4 + $0x1], 1 }

</bundles_post_ra>
